<compile_context>
chip_gen: v7x
topology: tpu7x:2x2x1
jax: 0.10.0
libtpu: 0.0.40
codegen_flags: <defaults>
</compile_context>

<pallas_src>
import jax
import jax.numpy as jnp
from jax.experimental import pallas as pl
from jax.experimental.pallas import tpu as pltpu

LANE = 128
NEG_INF = -1e30
TARGET_OFF = 64      # lane offset of the target net's Q values in the fused slab
ACT_LANE = 126       # spare lane carrying the greedy action (as f32)
SEL_LANE = 127       # spare lane carrying the target Q at the greedy action

_VMEM = pl.BlockSpec(memory_space=pltpu.MemorySpace.VMEM)


def _has_two_tensorcores():
    """True on chips with 2 TensorCores per chip (v7x); v5e/v6e have 1."""
    try:
        kind = jax.devices()[0].device_kind.lower()
    except Exception:
        return False
    return "v7" in kind


# ----------------------------------------------------------------------------
# Kernels
# ----------------------------------------------------------------------------
def _fc1_vpu(x, w1, b1):
    """fc1 with tiny K (state_dim): broadcast FMAs on the VPU, no MXU."""
    s = x.shape[1]
    if s <= 8:
        h = b1 + x[:, 0:1] * w1[0:1, :]
        for k in range(1, s):                     # unrolled at trace time
            h = h + x[:, k:k + 1] * w1[k:k + 1, :]
    else:
        h = jnp.dot(x, w1, preferred_element_type=jnp.float32) + b1
    return jnp.maximum(h, 0.0)                    # ReLU


def qnet_kernel(x_ref, w1_ref, b1_ref, w2_ref, b2_ref, out_ref):
    """relu(x @ w1 + b1) @ w2 + b2; fc2 on the MXU in bf16 with f32 acc."""
    h = _fc1_vpu(x_ref[...], w1_ref[...], b1_ref[...])
    q = jnp.dot(h.astype(jnp.bfloat16), w2_ref[...],
                preferred_element_type=jnp.float32) + b2_ref[...]
    out_ref[...] = q.astype(out_ref.dtype)


def ddqn_fused_kernel(x_ref, w1_ref, b1_ref, w2_ref, b2_ref, bias_ref, out_ref):
    """Online + target nets fused into one fc1 slab and ONE MXU matmul.

    Output slab lanes: [0, A) online Q | [TARGET_OFF, TARGET_OFF+A) target Q |
    ACT_LANE greedy action (f32) | SEL_LANE target Q at that action.
    """
    # fc1 for BOTH nets at once: (B, 2H) slab, 3 broadcast FMAs on the VPU.
    h = _fc1_vpu(x_ref[...], w1_ref[...], b1_ref[...])
    # fc2 for BOTH nets in ONE block-structured bf16 MXU matmul, f32 acc.
    q = jnp.dot(h.astype(jnp.bfloat16), w2_ref[...],
                preferred_element_type=jnp.float32) + b2_ref[...]

    b, n = q.shape
    lane = jax.lax.broadcasted_iota(jnp.int32, (b, n), 1)
    lane_f = lane.astype(jnp.float32)

    # Greedy action over the ONLINE lanes: bias is 0 there, -inf elsewhere,
    # so no per-tile valid-mask is needed.
    q_masked = q + bias_ref[...]
    m = jnp.max(q_masked, axis=-1, keepdims=True)
    amax_f = jnp.min(jnp.where(q_masked == m, lane_f, jnp.float32(n)),
                     axis=-1, keepdims=True)              # first argmax, (B, 1)
    amax = amax_f.astype(jnp.int32)

    # Target-net Q at the greedy online action (gather via lane compare).
    q_sel = jnp.sum(jnp.where(lane == amax + TARGET_OFF, q, 0.0),
                    axis=-1, keepdims=True)

    # Pack action + selected Q into spare lanes -> single lane-dense output.
    out = jnp.where(lane == ACT_LANE, amax_f, q)
    out = jnp.where(lane == SEL_LANE, q_sel, out)
    out_ref[...] = out.astype(out_ref.dtype)


# ----------------------------------------------------------------------------
# Parameter preparation (hoisted out of the per-step path)
# ----------------------------------------------------------------------------
def prepare_qnet_params(w1, b1, w2, b2):
    """Lane-pad fc2 to 128 lanes and cast it to bf16, once."""
    action_dim = w2.shape[1]
    pad = (-action_dim) % LANE
    w2p = jnp.pad(w2, ((0, 0), (0, pad))).astype(jnp.bfloat16)
    b2p = jnp.pad(b2.reshape(1, -1), ((0, 0), (0, pad))).astype(jnp.float32)
    return dict(
        w1=jnp.asarray(w1, jnp.float32),
        b1=jnp.asarray(b1, jnp.float32).reshape(1, -1),
        w2=w2p, b2=b2p, action_dim=action_dim,
    )


def prepare_ddqn_params(online, target):
    """Fuse online + target nets: one fc1 slab, one block-structured bf16 W2."""
    w1o, b1o, w2o, b2o = online
    w1t, b1t, w2t, b2t = target
    state_dim, hidden = w1o.shape
    action_dim = w2o.shape[1]
    assert action_dim <= TARGET_OFF and TARGET_OFF + action_dim <= ACT_LANE

    w1f = jnp.concatenate([w1o, w1t], axis=1).astype(jnp.float32)        # (S, 2H)
    b1f = jnp.concatenate([b1o.reshape(1, -1), b1t.reshape(1, -1)],
                          axis=1).astype(jnp.float32)                     # (1, 2H)

    w2f = jnp.zeros((2 * hidden, LANE), jnp.float32)
    w2f = w2f.at[:hidden, :action_dim].set(w2o)
    w2f = w2f.at[hidden:, TARGET_OFF:TARGET_OFF + action_dim].set(w2t)
    w2f = w2f.astype(jnp.bfloat16)                                        # (2H, 128)

    b2f = jnp.zeros((1, LANE), jnp.float32)
    b2f = b2f.at[0, :action_dim].set(b2o.reshape(-1))
    b2f = b2f.at[0, TARGET_OFF:TARGET_OFF + action_dim].set(b2t.reshape(-1))

    # Additive argmax bias: 0 on online lanes, -inf elsewhere.
    bias = jnp.where(jnp.arange(LANE) < action_dim, 0.0, NEG_INF)
    bias = bias.reshape(1, LANE).astype(jnp.float32)

    return dict(w1=w1f, b1=b1f, w2=w2f, b2=b2f, bias=bias,
                action_dim=action_dim, hidden_dim=hidden, state_dim=state_dim)


# ----------------------------------------------------------------------------
# Forward wrappers
# ----------------------------------------------------------------------------
def _use_grid(batch, block_batch, force_grid):
    return (
        block_batch is not None
        and 0 < block_batch < batch
        and batch % block_batch == 0
        and block_batch % 8 == 0
        and (force_grid or _has_two_tensorcores())   # serial grid = pure overhead on 1-TC chips
    )


def qnet_forward(x, params, *, block_batch=None, force_grid=False):
    """Qnet.forward: relu(x @ w1 + b1) @ w2 + b2. Returns (B, action_dim) f32."""
    batch, state_dim = x.shape
    w1, b1, w2, b2 = params["w1"], params["b1"], params["w2"], params["b2"]
    action_dim = params["action_dim"]
    hidden = w1.shape[1]
    a_pad = w2.shape[1]

    if not _use_grid(batch, block_batch, force_grid):
        out = pl.pallas_call(
            qnet_kernel,
            out_shape=jax.ShapeDtypeStruct((batch, a_pad), jnp.float32),
            in_specs=[_VMEM] * 5,
            out_specs=_VMEM,
        )(x, w1, b1, w2, b2)
    else:
        tb = block_batch
        out = pl.pallas_call(
            qnet_kernel,
            out_shape=jax.ShapeDtypeStruct((batch, a_pad), jnp.float32),
            grid=(batch // tb,),
            in_specs=[
                pl.BlockSpec((tb, state_dim), lambda i: (i, 0)),
                pl.BlockSpec((state_dim, hidden), lambda i: (0, 0)),
                pl.BlockSpec((1, hidden), lambda i: (0, 0)),
                pl.BlockSpec((hidden, a_pad), lambda i: (0, 0)),
                pl.BlockSpec((1, a_pad), lambda i: (0, 0)),
            ],
            out_specs=pl.BlockSpec((tb, a_pad), lambda i: (i, 0)),
            compiler_params=pltpu.CompilerParams(dimension_semantics=("parallel",)),
        )(x, w1, b1, w2, b2)

    return out[:, :action_dim]


def ddqn_fused_forward(x, fused_params, *, block_batch=None, force_grid=False):
    """One pallas_call per DDQN evaluation step.

    Returns:
      q_online : (B, action_dim) online-net Q values
      action   : (B,)  int32 greedy action from the online net
      q_target : (B,)  target-net Q value at that action
    """
    batch, state_dim = x.shape
    p = fused_params
    w1, b1, w2, b2, bias = p["w1"], p["b1"], p["w2"], p["b2"], p["bias"]
    action_dim = p["action_dim"]
    h2 = w1.shape[1]   # 2 * hidden_dim

    if not _use_grid(batch, block_batch, force_grid):
        out = pl.pallas_call(
            ddqn_fused_kernel,
            out_shape=jax.ShapeDtypeStruct((batch, LANE), jnp.float32),
            in_specs=[_VMEM] * 6,
            out_specs=_VMEM,
        )(x, w1, b1, w2, b2, bias)
    else:
        tb = block_batch
        out = pl.pallas_call(
            ddqn_fused_kernel,
            out_shape=jax.ShapeDtypeStruct((batch, LANE), jnp.float32),
            grid=(batch // tb,),
            in_specs=[
                pl.BlockSpec((tb, state_dim), lambda i: (i, 0)),
                pl.BlockSpec((state_dim, h2), lambda i: (0, 0)),
                pl.BlockSpec((1, h2), lambda i: (0, 0)),
                pl.BlockSpec((h2, LANE), lambda i: (0, 0)),
                pl.BlockSpec((1, LANE), lambda i: (0, 0)),
                pl.BlockSpec((1, LANE), lambda i: (0, 0)),
            ],
            out_specs=pl.BlockSpec((tb, LANE), lambda i: (i, 0)),
            compiler_params=pltpu.CompilerParams(dimension_semantics=("parallel",)),
        )(x, w1, b1, w2, b2, bias)

    q_on = out[:, :action_dim]
    act = out[:, ACT_LANE].astype(jnp.int32)
    q_sel = out[:, SEL_LANE]
    return q_on, act, q_sel


# ----------------------------------------------------------------------------
# Init + reference
# ----------------------------------------------------------------------------
def init_params(key, state_dim, hidden_dim, action_dim):
    """torch.nn.Linear-style init (U[-1/sqrt(in), 1/sqrt(in)]); weights as (in, out)."""
    k1, k2, k3, k4 = jax.random.split(key, 4)
    b1 = 1.0 / jnp.sqrt(jnp.float32(state_dim))
    b2 = 1.0 / jnp.sqrt(jnp.float32(hidden_dim))
    w1 = jax.random.uniform(k1, (state_dim, hidden_dim), jnp.float32, -b1, b1)
    bb1 = jax.random.uniform(k2, (1, hidden_dim), jnp.float32, -b1, b1)
    w2 = jax.random.uniform(k3, (hidden_dim, action_dim), jnp.float32, -b2, b2)
    bb2 = jax.random.uniform(k4, (1, action_dim), jnp.float32, -b2, b2)
    return w1, bb1, w2, bb2


def qnet_ref(x, w1, b1, w2, b2):
    return jnp.maximum(x @ w1 + b1, 0.0) @ w2 + b2


# ----------------------------------------------------------------------------
if __name__ == "__main__":
    state_dim = 3       # Pendulum-v1 observation dim
    hidden_dim = 128
    action_dim = 11

    key = jax.random.PRNGKey(0)
    kx, kon, ktg, kbig = jax.random.split(key, 4)

    online_raw = init_params(kon, state_dim, hidden_dim, action_dim)
    target_raw = init_params(ktg, state_dim, hidden_dim, action_dim)

    # Padding / bf16 casting / net fusion done ONCE (not per step).
    online = prepare_qnet_params(*online_raw)
    fused = prepare_ddqn_params(online_raw, target_raw)

    # --- acting path: small batch, single grid point --------------------------
    batch = 8
    x = jax.random.normal(kx, (batch, state_dim), jnp.float32)

    q = jax.block_until_ready(qnet_forward(x, online))
    q_r = qnet_ref(x, *online_raw)
    assert q.shape == (batch, action_dim)
    assert jnp.allclose(q, q_r, atol=5e-2, rtol=1e-2)       # bf16 fc2 tolerance

    # --- fused DDQN step: both nets + greedy action + target-Q in one call ----
    q_on, act, q_sel = ddqn_fused_forward(x, fused)
    jax.block_until_ready((q_on, act, q_sel))
    q_on_r = qnet_ref(x, *online_raw)
    q_tg_r = qnet_ref(x, *target_raw)
    assert jnp.allclose(q_on, q_on_r, atol=5e-2, rtol=1e-2)
    # action is self-consistent with the kernel's own Q values
    assert jnp.array_equal(act, jnp.argmax(q_on, axis=-1).astype(jnp.int32))
    # target Q gathered at the kernel's greedy action matches the reference
    assert jnp.allclose(q_sel, q_tg_r[jnp.arange(batch), act], atol=5e-2, rtol=1e-2)

    # --- training path: larger batch; parallel grid only pays off on 2-TC (v7x)
    #     chips.  force_grid=True here just to exercise/validate that path. ----
    big_batch = 256
    xb = jax.random.normal(kbig, (big_batch, state_dim), jnp.float32)

    qb = jax.block_until_ready(
        qnet_forward(xb, online, block_batch=128, force_grid=True))
    qb_r = qnet_ref(xb, *online_raw)
    assert qb.shape == (big_batch, action_dim)
    assert jnp.allclose(qb, qb_r, atol=5e-2, rtol=1e-2)

    qb_on, actb, qb_sel = ddqn_fused_forward(
        xb, fused, block_batch=128, force_grid=True)
    jax.block_until_ready((qb_on, actb, qb_sel))
    qb_on_r = qnet_ref(xb, *online_raw)
    qb_tg_r = qnet_ref(xb, *target_raw)
    assert jnp.allclose(qb_on, qb_on_r, atol=5e-2, rtol=1e-2)
    assert jnp.array_equal(actb, jnp.argmax(qb_on, axis=-1).astype(jnp.int32))
    assert jnp.allclose(qb_sel, qb_tg_r[jnp.arange(big_batch), actb],
                        atol=5e-2, rtol=1e-2)

    print("KERNEL_OK")
</pallas_src>

<mosaic_0001>
module attributes {stable_mosaic.version = 11 : i64} {
  func.func @qnet_kernel(%arg0: memref<8x3xf32, #tpu.memory_space<vmem>>, %arg1: memref<3x128xf32, #tpu.memory_space<vmem>>, %arg2: memref<1x128xf32, #tpu.memory_space<vmem>>, %arg3: memref<128x128xbf16, #tpu.memory_space<vmem>>, %arg4: memref<1x128xf32, #tpu.memory_space<vmem>>, %arg5: memref<8x128xf32, #tpu.memory_space<vmem>>) attributes {dimension_semantics = [], scalar_prefetch = 0 : i64, scratch_operands = 0 : i64, tpu.core_type = #tpu.core_type<tc>} {
    %c0 = arith.constant 0 : index
    %c0_0 = arith.constant 0 : index
    %0 = vector.load %arg0[%c0, %c0_0] : memref<8x3xf32, #tpu.memory_space<vmem>>, vector<8x3xf32>
    %c0_1 = arith.constant 0 : index
    %c0_2 = arith.constant 0 : index
    %1 = vector.load %arg1[%c0_1, %c0_2] : memref<3x128xf32, #tpu.memory_space<vmem>>, vector<3x128xf32>
    %c0_3 = arith.constant 0 : index
    %c0_4 = arith.constant 0 : index
    %2 = vector.load %arg2[%c0_3, %c0_4] : memref<1x128xf32, #tpu.memory_space<vmem>>, vector<1x128xf32>
    %3 = vector.extract_strided_slice %0 {offsets = [0, 0], sizes = [8, 1], strides = [1, 1]} : vector<8x3xf32> to vector<8x1xf32>
    %4 = vector.extract_strided_slice %1 {offsets = [0, 0], sizes = [1, 128], strides = [1, 1]} : vector<3x128xf32> to vector<1x128xf32>
    %5 = vector.broadcast %3 : vector<8x1xf32> to vector<8x128xf32>
    %6 = vector.broadcast %4 : vector<1x128xf32> to vector<8x128xf32>
    %7 = arith.mulf %5, %6 : vector<8x128xf32>
    %8 = vector.broadcast %2 : vector<1x128xf32> to vector<8x128xf32>
    %9 = arith.addf %8, %7 : vector<8x128xf32>
    %10 = vector.extract_strided_slice %0 {offsets = [0, 1], sizes = [8, 1], strides = [1, 1]} : vector<8x3xf32> to vector<8x1xf32>
    %11 = vector.extract_strided_slice %1 {offsets = [1, 0], sizes = [1, 128], strides = [1, 1]} : vector<3x128xf32> to vector<1x128xf32>
    %12 = vector.broadcast %10 : vector<8x1xf32> to vector<8x128xf32>
    %13 = vector.broadcast %11 : vector<1x128xf32> to vector<8x128xf32>
    %14 = arith.mulf %12, %13 : vector<8x128xf32>
    %15 = arith.addf %9, %14 : vector<8x128xf32>
    %16 = vector.extract_strided_slice %0 {offsets = [0, 2], sizes = [8, 1], strides = [1, 1]} : vector<8x3xf32> to vector<8x1xf32>
    %17 = vector.extract_strided_slice %1 {offsets = [2, 0], sizes = [1, 128], strides = [1, 1]} : vector<3x128xf32> to vector<1x128xf32>
    %18 = vector.broadcast %16 : vector<8x1xf32> to vector<8x128xf32>
    %19 = vector.broadcast %17 : vector<1x128xf32> to vector<8x128xf32>
    %20 = arith.mulf %18, %19 : vector<8x128xf32>
    %21 = arith.addf %15, %20 : vector<8x128xf32>
    %cst = arith.constant 0.000000e+00 : f32
    %22 = vector.broadcast %cst : f32 to vector<8x128xf32>
    %23 = arith.maximumf %21, %22 : vector<8x128xf32>
    %24 = arith.truncf %23 : vector<8x128xf32> to vector<8x128xbf16>
    %c0_5 = arith.constant 0 : index
    %c0_6 = arith.constant 0 : index
    %25 = vector.load %arg3[%c0_5, %c0_6] : memref<128x128xbf16, #tpu.memory_space<vmem>>, vector<128x128xbf16>
    %cst_7 = arith.constant dense<0.000000e+00> : vector<8x128xf32>
    %26 = tpu.matmul %24, %25, %cst_7 {dimension_numbers = #tpu.dot_dimension_numbers<[1], [0], [0], [1], [0, 0, 1, 1], [], []>} : vector<8x128xbf16>, vector<128x128xbf16>, vector<8x128xf32> -> vector<8x128xf32>
    %c0_8 = arith.constant 0 : index
    %c0_9 = arith.constant 0 : index
    %27 = vector.load %arg4[%c0_8, %c0_9] : memref<1x128xf32, #tpu.memory_space<vmem>>, vector<1x128xf32>
    %28 = vector.broadcast %27 : vector<1x128xf32> to vector<8x128xf32>
    %29 = arith.addf %26, %28 : vector<8x128xf32>
    %c0_10 = arith.constant 0 : index
    %c0_11 = arith.constant 0 : index
    %30 = vector.load %arg5[%c0_10, %c0_11] : memref<8x128xf32, #tpu.memory_space<vmem>>, vector<8x128xf32>
    tpu.vector_store %arg5[%c0_10, %c0_11], %29 {strides = array<i32>} : memref<8x128xf32, #tpu.memory_space<vmem>>, vector<8x128xf32>,
    return
  }
}

</mosaic_0001>

<bundles_post_ra>
// kernel: tpu_custom_call.1
= control target key start
LH: loop header
LB: loop body
LE: loop exit
PB: predicated region body
PF: predicated region fallthrough
CT: control target
= control target key end

     0   :  { %10 = vsyncpa [#allocation3], 0  ;;  %s388_s0 = inlined_call_operand.vmem [shape: f32[8,3], index: 0, kind: input, shape index: {}]   ;;  %s389_s1 = inlined_call_operand.vmem [shape: f32[3,128], index: 1, kind: input, shape index: {}]   ;;  %s390_s2 = inlined_call_operand.vmem [shape: f32[1,128], index: 2, kind: input, shape index: {}]   ;;  %s391_s3 = inlined_call_operand.hbm [shape: bf16[128,128], index: 3, kind: input, shape index: {}]   ;;  %s392_s4 = inlined_call_operand.vmem [shape: f32[1,128], index: 4, kind: input, shape index: {}]   ;;  %s393_s5 = inlined_call_operand.hbm [shape: f32[8,128], index: 5, kind: output, shape index: {}]  }
   0x1   :  { %11 = vsyncpa [#allocation4], 0  ;;  %s313_s18 = smov [#allocation2]   ;;  %s265_s22 = scalar_lea.hbm %s391_s3, 1024 }
   0x2   :  { %s23_s19 = sshll.u32 %s313_s18, 4  ;;  %p266_p0 = scmp.ne.s32.totalorder %s391_s3, %s265_s22  ;;  %s24_s19 = int_to_ptr.vmem [resolvable:$true] %s23_s19 }
   0x3   :  { %p269_p1 = scmp.lt.u32.totalorder %s265_s22, %s391_s3 }
   0x5   :  { %p271_p2 = pnand %p269_p1, %p266_p0 }
   0x7   :  { %274 = shalt.err (!%p271_p2)
}
   0x8   :  { %s275_s27 = scalar_lea.vmem %s24_s19, 1024  ;;  %p280_p4 = scmp.lt.s32.totalorder %s24_s19, %s24_s19 }
   0x9   :  { %p276_p3 = scmp.ne.s32.totalorder %s24_s19, %s275_s27  ;;  %p281_p5 = scmp.lt.s32.totalorder %s275_s27, %s275_s27 }
   0xb   :  { %p282_p6 = por %p281_p5, %p280_p4 }
   0xd   :  { %p283_p7 = pnand %p282_p6, %p276_p3 }
   0xf   :  { %286 = shalt.err (!%p283_p7)
}
  0x10   :  { %s314_s28 = smov 64   ;;  %s315_s29 = smov 4  }
  0x11   :  { %29 = dma.hbm_to_vmem [thread:$0]  %s391_s3, 1024, %s24_s19, [#allocation3], %s314_s28, %s314_s28, %s315_s29  }
  0x12   :  { %309 = dma.done.wait [#allocation3], 1024  }
  0x13   :  { %310 = vsyncadd [#allocation3], 4294966272  ;;  %v316_v0 = vmov 0   ;;  %v317_v1 = vmov 2   ;;  %v318_v2 = vmov 0.0   ;;  %v36_v3 = vld [vmem:[%s388_s0] sm:$0xff]  ;;  %v44_v13 = vlaneseq }
  0x14   :  { %253 = vset.pattern.permute.xlu0 %v316_v0  ;;  %255 = vset.pattern.permute.xlu1 %v317_v1  ;;  %v257_v4 = vld [vmem:[#allocation2] sm:$0xff]   ;;  %v258_v5 = vld [vmem:[#allocation2 + $0x8] sm:$0xff]   ;;  %v319_v6 = vmov 1   ;;  %v259_v7 = vld [vmem:[#allocation2 + $0x10] sm:$0xff]   ;;  %vm320_vm0 = vmmov 0   ;;  %s321_s12 = smov [#allocation5]  }
  0x15   :  { %224 = vmatprep.subr.bf16.mxu0 %v318_v2  ;;  %41 = vperm.xlu0 %253, %v36_v3   ;;  %v260_v8 = vld [vmem:[#allocation2 + $0x18] sm:$0xff]   ;;  %v261_v9 = vld [vmem:[#allocation2 + $0x20] sm:$0xff]   ;;  %v262_v10 = vld [vmem:[#allocation2 + $0x28] sm:$0xff]   ;;  %v45_v14 = vshrl.u32 %v44_v13, 7  ;;  %s196_s13 = sshll.u32 %s321_s12, 4  ;;  %s197_s13 = int_to_ptr.vmem [resolvable:$true] %s196_s13 }
  0x16   :  { %67 = vperm.xlu1 %255, %v36_v3   ;;  %225 = vmatpush3.bf16.msra.mxu0 %v257_v4  ;;  %v263_v11 = vld [vmem:[#allocation2 + $0x30] sm:$0xff]   ;;  %v264_v12 = vld [vmem:[#allocation2 + $0x38] sm:$0xff]   ;;  %v37_v16 = vld [vmem:[%s389_s1] sm:$0x7]  ;;  %p292_p9 = scmp.lt.s32.totalorder %s197_s13, %s197_s13 }
  0x17   :  { %226 = vmatprep.subr.bf16.mxu0 %v318_v2  ;;  %240 = vmatprep.mubr.msk.bf16.mxu0 %vm320_vm0, %v318_v2  ;;  %v46_v15 = vsub.s32 0, %v45_v14  ;;  %v62_v18 = vsub.s32 1, %v45_v14  ;;  %v72_v19 = vsub.s32 2, %v45_v14  ;;  %v205_v24 = vld [vmem:[%s390_s2] ss:$0 sm:$0xff]  ;;  %s287_s2 = scalar_lea.vmem %s197_s13, 128 }
  0x18   :  { %v206_v34 = vld [vmem:[%s392_s4] ss:$0 sm:$0xff]  ;;  %p288_p8 = scmp.ne.s32.totalorder %s197_s13, %s287_s2  ;;  %p293_p10 = scmp.lt.s32.totalorder %s287_s2, %s287_s2 }
  0x19   :  { %254 = vset.pattern.permute.xlu0 %v319_v6  ;;  %v47_v17 = vrot.slane %v37_v16, %v46_v15  ;;  %v63_v22 = vrot.slane %v37_v16, %v62_v18  ;;  %v73_v23 = vrot.slane %v37_v16, %v72_v19 }
  0x1a   :  { %57 = vperm.xlu0 %254, %v36_v3   ;;  %227 = vmatpush3.bf16.msra.mxu0 %v258_v5  ;;  %p294_p11 = por %p293_p10, %p292_p9 }
  0x1b   :  { %228 = vmatprep.subr.bf16.mxu0 %v318_v2 }
  0x1c   :  { %p295_p12 = pnand %p294_p11, %p288_p8 }
  0x1e   :  { %256 = vset.pattern.permute.xlu0 %v317_v1  ;;  %229 = vmatpush3.bf16.msra.mxu0 %v259_v7 }
  0x1f   :  { %230 = vmatprep.subr.bf16.mxu0 %v318_v2 }
  0x22   :  { %231 = vmatpush3.bf16.msra.mxu0 %v260_v8 }
  0x23   :  { %232 = vmatprep.subr.bf16.mxu0 %v318_v2 }
  0x26   :  { %233 = vmatpush3.bf16.msra.mxu0 %v261_v9 }
  0x27   :  { %234 = vmatprep.subr.bf16.mxu0 %v318_v2 }
  0x2a   :  { %235 = vmatpush3.bf16.msra.mxu0 %v262_v10 }
  0x2b   :  { %236 = vmatprep.subr.bf16.mxu0 %v318_v2 }
  0x2e   :  { %237 = vmatpush3.bf16.msra.mxu0 %v263_v11 }
  0x2f   :  { %238 = vmatprep.subr.bf16.mxu0 %v318_v2 }
  0x32   :  { %239 = vmatpush3.bf16.msra.mxu0 %v264_v12 }
  0x94   :  { %v42_v20 = vpop.permute.xlu0 %41 }
  0x95   :  { %v48_v21 = vmul.f32 %v47_v17, %v42_v20  ;;  %v68_v25 = vpop.permute.xlu1 %67 }
  0x96   :  { %v74_v29 = vmul.f32 %v73_v23, %v68_v25 }
  0x97   :  { %v55_v27 = vadd.f32 %v205_v24, %v48_v21 }
  0x99   :  { %v58_v26 = vpop.permute.xlu0 %57 }
  0x9a   :  { %v64_v28 = vmul.f32 %v63_v22, %v58_v26 }
  0x9c   :  { %v65_v30 = vadd.f32 %v64_v28, %v55_v27 }
  0x9e   :  { %v75_v31 = vadd.f32 %v74_v29, %v65_v30 }
  0xa0   :  { %v76_v32 = vmax.f32 %v75_v31, 0.0 }
  0xa2   :  { %v77_v33 = vpack.c.bf16 %v76_v32, %v76_v32 }
  0xa4   :  { %241 = vmatmul.mubr.bf16.vlgmr.msra.gmra.mrb[0].mxu0 %v77_v33 }
 0x177   :  { %v183_v35 = vpop.f32.mrb[0].mxu0 }
 0x178   :  { %v184_v36 = vadd.f32 %v206_v34, %v183_v35  ;;  %v242_v37 = vpop.f32.mrb[1].mxu0 }
 0x179   :  { %v186_v38 = vpop.f32.mrb[2].mxu0 }
 0x17a   :  { %189 = vst [vmem:[#allocation5] sm:$0xff] %v184_v36  ;;  %v243_v39 = vpop.f32.mrb[3].mxu0 }
 0x17b   :  { %298 = shalt.err (!%p295_p12)
}
 0x17c   :  { %s299_s4 = scalar_lea.hbm %s393_s5, 128 }
 0x17d   :  { %p300_p13 = scmp.ne.s32.totalorder %s393_s5, %s299_s4  ;;  %p303_p0 = scmp.lt.u32.totalorder %s299_s4, %s393_s5 }
 0x17f   :  { %p305_p1 = pnand %p303_p0, %p300_p13 }
 0x181   :  { %308 = shalt.err (!%p305_p1)
}
 0x182   :  { %199 = dma.vmem_to_hbm [thread:$0]  %s197_s13, 128, %s393_s5, [#allocation4]  }
 0x183   :  { %311 = dma.done.wait [#allocation4], 128  }
 0x184   :  { %312 = vsyncadd [#allocation4], 4294967168 }
 0x185   :  { %203 = vsyncpa [#allocation3], 1 }
 0x186   :  { %204 = vsyncpa [#allocation4], 1 }

</bundles_post_ra>
